<compile_context>
chip_gen: v7x
topology: tpu7x:2x2x1
jax: 0.10.0
libtpu: 0.0.40
codegen_flags: <defaults>
</compile_context>

<pallas_src>
import numpy as np
import jax
import jax.numpy as jnp
from jax import lax
from jax.experimental import pallas as pl
from jax.experimental.pallas import tpu as pltpu


_N_PARTIALS = 11  # partial scalars emitted per row block


def _round_up(x, m):
    return ((x + m - 1) // m) * m


def _make_kernel(data_scope_min, data_scope_max, background_label):
    dmin = float(data_scope_min)
    dmax = float(data_scope_max)
    bkg = float(background_label)

    def kernel(o_r, t_r, m_r, v_r, o_c, t_c, m_c, v_c, out_ref,
               ra_acc, rb_acc, saa_acc, sab_acc, sbb_acc,
               bce_acc, win_acc, mbkg_acc):
        i = pl.program_id(0)          # row block (sublane axis, parallel)
        j = pl.program_id(1)          # lane block (reduction axis, arbitrary)
        nj = pl.num_programs(1)

        # ---- init per-row-block accumulators at the start of the j loop ----
        @pl.when(j == 0)
        def _():
            ra_acc[...] = jnp.zeros_like(ra_acc)
            rb_acc[...] = jnp.zeros_like(rb_acc)
            saa_acc[...] = jnp.zeros_like(saa_acc)
            sab_acc[...] = jnp.zeros_like(sab_acc)
            sbb_acc[...] = jnp.zeros_like(sbb_acc)
            bce_acc[...] = jnp.zeros_like(bce_acc)
            win_acc[...] = jnp.zeros_like(win_acc)
            mbkg_acc[...] = jnp.zeros_like(mbkg_acc)

        m_row = m_r[...]              # (1, TJ)  lane-major event data
        o_row = o_r[...]
        t_row = t_r[...]
        v_row = v_r[...]
        m_col = m_c[...]              # (TI, 1)  sublane-major event data
        o_col = o_c[...]
        t_col = t_c[...]
        v_col = v_c[...]

        # background-event indicator (0/1) on both layouts (valid = not padding)
        w_row = jnp.where((t_row == bkg) & (v_row > 0.5), 1.0, 0.0)   # (1, TJ)
        w_col = jnp.where((t_col == bkg) & (v_col > 0.5), 1.0, 0.0)   # (TI, 1)

        # ---- pairwise-distance tile, pre-masked on the lane (j) axis --------
        daw = jnp.abs(m_col - m_row) * w_row     # (TI, TJ)  |mass_i-mass_j|*w_j
        dbw = jnp.abs(o_col - o_row) * w_row     # (TI, TJ)  |out_i - out_j|*w_j

        # weighted row sums needed by the expanded double-centering formula
        ra_acc[...] += jnp.sum(daw, axis=1, keepdims=True)            # (TI, 1)
        rb_acc[...] += jnp.sum(dbw, axis=1, keepdims=True)

        # per-lane partial sums of the three O(N^2) quantities (VPU adds along
        # sublanes; the single cross-lane reduce is deferred to j == last)
        qa = daw * w_col                                              # w_i w_j a_ij
        saa_acc[...] += jnp.sum(qa * daw, axis=0, keepdims=True)      # (1, TJ)
        sab_acc[...] += jnp.sum(qa * dbw, axis=0, keepdims=True)
        sbb_acc[...] += jnp.sum(w_col * dbw * dbw, axis=0, keepdims=True)

        # ---- O(N) pieces (window BCE, global counts): computed exactly once,
        #      while streaming the lane axis on the i == 0 row block ----------
        @pl.when(i == 0)
        def _():
            win = jnp.where((m_row > dmin) & (m_row < dmax) & (v_row > 0.5),
                            1.0, 0.0)
            log_o = jnp.maximum(jnp.log(o_row), -100.0)     # torch BCELoss clamp
            log_1mo = jnp.maximum(jnp.log(1.0 - o_row), -100.0)
            bce = -(t_row * log_o + (1.0 - t_row) * log_1mo)
            bce_acc[...] += bce * win
            win_acc[...] += win
            mbkg_acc[...] += w_row

        # ---- finalize this row block: emit partial scalars ------------------
        @pl.when(j == nj - 1)
        def _():
            ra = ra_acc[...]                                  # (TI, 1)
            rb = rb_acc[...]
            wra = w_col * ra
            wrb = w_col * rb
            s_aa = jnp.sum(saa_acc[...])
            s_ab = jnp.sum(sab_acc[...])
            s_bb = jnp.sum(sbb_acc[...])
            c_aa = jnp.sum(wra * ra)
            c_ab = jnp.sum(wra * rb)
            c_bb = jnp.sum(wrb * rb)
            s_a = jnp.sum(wra)
            s_b = jnp.sum(wrb)
            bce_sum = jnp.sum(bce_acc[...])
            n_win = jnp.sum(win_acc[...])
            m_bkg = jnp.sum(mbkg_acc[...])

            lane = lax.broadcasted_iota(jnp.int32, (1, 8, 128), 2)
            vals = (s_aa, s_ab, s_bb, c_aa, c_ab, c_bb, s_a, s_b,
                    bce_sum, n_win, m_bkg)
            out = jnp.zeros((1, 8, 128), jnp.float32)
            for k, v in enumerate(vals):
                out = out + jnp.where(lane == k, v, 0.0)
            out_ref[...] = out

    return kernel


def bce_disco_loss(output, target, mass, *, disco_factor=10.0,
                   data_scope_min=125.0 - 5, data_scope_max=125.0 + 5,
                   background_label=0):
    """output, target, mass: (batch, 1) arrays. Returns the scalar loss (f32)."""
    n = int(output.shape[0])

    # lane-major padding: multiple of 128; sublane-major padding: multiple of 8
    n_lane = _round_up(max(n, 1), 128)
    tj = min(512, n_lane)
    n_lane = _round_up(n_lane, tj)
    n_sub = _round_up(max(n, 1), 8)
    ti = min(256, n_sub)
    n_sub = _round_up(n_sub, ti)
    num_i = n_sub // ti
    num_j = n_lane // tj

    def row(x):
        r = jnp.zeros((1, n_lane), jnp.float32)
        return r.at[0, :n].set(jnp.reshape(x, (-1,)).astype(jnp.float32))

    def col(x):
        c = jnp.zeros((n_sub, 1), jnp.float32)
        return c.at[:n, 0].set(jnp.reshape(x, (-1,)).astype(jnp.float32))

    o_r, t_r, m_r = row(output), row(target), row(mass)
    v_r = jnp.zeros((1, n_lane), jnp.float32).at[0, :n].set(1.0)
    o_c, t_c, m_c = col(output), col(target), col(mass)
    v_c = jnp.zeros((n_sub, 1), jnp.float32).at[:n, 0].set(1.0)

    kernel = _make_kernel(data_scope_min, data_scope_max, background_label)

    row_spec = pl.BlockSpec((1, tj), lambda i, j: (0, j))
    col_spec = pl.BlockSpec((ti, 1), lambda i, j: (i, 0))

    parts = pl.pallas_call(
        kernel,
        out_shape=jax.ShapeDtypeStruct((num_i, 8, 128), jnp.float32),
        grid_spec=pltpu.PrefetchScalarGridSpec(
            num_scalar_prefetch=0,
            grid=(num_i, num_j),
            in_specs=[row_spec, row_spec, row_spec, row_spec,
                      col_spec, col_spec, col_spec, col_spec],
            out_specs=pl.BlockSpec((1, 8, 128), lambda i, j: (i, 0, 0)),
            scratch_shapes=[
                pltpu.VMEM((ti, 1), jnp.float32),   # ra: weighted row sums of |dm|
                pltpu.VMEM((ti, 1), jnp.float32),   # rb: weighted row sums of |do|
                pltpu.VMEM((1, tj), jnp.float32),   # per-lane partials of S_aa
                pltpu.VMEM((1, tj), jnp.float32),   # per-lane partials of S_ab
                pltpu.VMEM((1, tj), jnp.float32),   # per-lane partials of S_bb
                pltpu.VMEM((1, tj), jnp.float32),   # per-lane window BCE sum
                pltpu.VMEM((1, tj), jnp.float32),   # per-lane window count
                pltpu.VMEM((1, tj), jnp.float32),   # per-lane background count
            ]),
        compiler_params=pltpu.CompilerParams(
            # row-block axis is independent (megacore split on v7x);
            # the lane axis carries the accumulators.
            dimension_semantics=("parallel", "arbitrary")),
    )(o_r, t_r, m_r, v_r, o_c, t_c, m_c, v_c)

    # ---- tiny scalar epilogue: combine per-row-block partials -----------------
    p = jnp.sum(parts[:, 0, :_N_PARTIALS], axis=0)
    (s_aa, s_ab, s_bb, c_aa, c_ab, c_bb, s_a, s_b,
     bce_sum, n_win, m_bkg) = [p[k] for k in range(_N_PARTIALS)]

    inv_m = 1.0 / jnp.maximum(m_bkg, 1.0)          # guard: empty background set
    num = s_ab - 2.0 * inv_m * c_ab + inv_m * inv_m * s_a * s_b
    den_a = s_aa - 2.0 * inv_m * c_aa + inv_m * inv_m * s_a * s_a
    den_b = s_bb - 2.0 * inv_m * c_bb + inv_m * inv_m * s_b * s_b
    disco = num * lax.rsqrt(jnp.maximum(den_a * den_b, 1e-30))
    bce_mean = bce_sum / jnp.maximum(n_win, 1.0)   # guard: empty mass window
    return bce_mean + float(disco_factor) * disco


def _reference_numpy(output, target, mass, disco_factor=10.0,
                     dmin=120.0, dmax=130.0, bkg_label=0.0):
    o = np.asarray(output, np.float64).reshape(-1)
    t = np.asarray(target, np.float64).reshape(-1)
    m = np.asarray(mass, np.float64).reshape(-1)
    win = (m > dmin) & (m < dmax)
    bce = -(t * np.maximum(np.log(o), -100.0)
            + (1.0 - t) * np.maximum(np.log(1.0 - o), -100.0))
    bce_mean = bce[win].mean()
    sel = t == bkg_label
    x, y = m[sel], o[sel]
    am = np.abs(x[:, None] - x[None, :])
    bm = np.abs(y[:, None] - y[None, :])
    aavg, bavg = am.mean(axis=1), bm.mean(axis=1)
    A = am - aavg[None, :] - aavg[:, None] + aavg.mean()
    B = bm - bavg[None, :] - bavg[:, None] + bavg.mean()
    disco = (A * B).mean() / np.sqrt((A * A).mean() * (B * B).mean())
    return bce_mean + disco_factor * disco


if __name__ == "__main__":
    key = jax.random.PRNGKey(0)
    k1, k2 = jax.random.split(key)

    # ---- small case: batch=16 -> single 16x128 tile, grid (1, 1) -------------
    batch = 16
    output = jax.nn.sigmoid(jax.random.normal(k1, (batch, 1), jnp.float32))
    target = (jnp.arange(batch, dtype=jnp.float32) % 2).reshape(batch, 1)
    mass = jnp.linspace(110.0, 140.0, batch, dtype=jnp.float32).reshape(batch, 1)

    loss = jax.block_until_ready(bce_disco_loss(output, target, mass))
    ref = _reference_numpy(output, target, mass)
    assert np.isfinite(float(loss)), "loss is not finite"
    assert np.allclose(float(loss), ref, rtol=1e-3, atol=1e-3), (float(loss), ref)

    # ---- multi-tile case: batch=600 -> grid (3, 2), exercises accumulators ----
    batch2 = 600
    output2 = jax.nn.sigmoid(jax.random.normal(k2, (batch2, 1), jnp.float32))
    target2 = (jnp.arange(batch2, dtype=jnp.float32) % 2).reshape(batch2, 1)
    mass2 = jnp.linspace(110.0, 140.0, batch2, dtype=jnp.float32).reshape(batch2, 1)

    loss2 = jax.block_until_ready(bce_disco_loss(output2, target2, mass2))
    ref2 = _reference_numpy(output2, target2, mass2)
    assert np.isfinite(float(loss2)), "loss2 is not finite"
    assert np.allclose(float(loss2), ref2, rtol=2e-3, atol=2e-3), (float(loss2), ref2)

    print("KERNEL_OK")
</pallas_src>

<mosaic_0001>
module attributes {stable_mosaic.version = 11 : i64} {
  func.func @kernel(%arg0: i32, %arg1: i32, %arg2: memref<1x128xf32, #tpu.memory_space<vmem>>, %arg3: memref<1x128xf32, #tpu.memory_space<vmem>>, %arg4: memref<1x128xf32, #tpu.memory_space<vmem>>, %arg5: memref<1x128xf32, #tpu.memory_space<vmem>>, %arg6: memref<16x1xf32, #tpu.memory_space<vmem>>, %arg7: memref<16x1xf32, #tpu.memory_space<vmem>>, %arg8: memref<16x1xf32, #tpu.memory_space<vmem>>, %arg9: memref<16x1xf32, #tpu.memory_space<vmem>>, %arg10: memref<1x8x128xf32, #tpu.memory_space<vmem>>, %arg11: memref<16x1xf32, #tpu.memory_space<vmem>>, %arg12: memref<16x1xf32, #tpu.memory_space<vmem>>, %arg13: memref<1x128xf32, #tpu.memory_space<vmem>>, %arg14: memref<1x128xf32, #tpu.memory_space<vmem>>, %arg15: memref<1x128xf32, #tpu.memory_space<vmem>>, %arg16: memref<1x128xf32, #tpu.memory_space<vmem>>, %arg17: memref<1x128xf32, #tpu.memory_space<vmem>>, %arg18: memref<1x128xf32, #tpu.memory_space<vmem>>) attributes {dimension_semantics = [#tpu.dimension_semantics<parallel>, #tpu.dimension_semantics<arbitrary>], iteration_bounds = array<i64: 1, 1>, scalar_prefetch = 0 : i64, scratch_operands = 8 : i64, tpu.core_type = #tpu.core_type<tc>, window_params = [{transform_indices = @transform_0, window_bounds = array<i64: 1, 128>}, {transform_indices = @transform_1, window_bounds = array<i64: 1, 128>}, {transform_indices = @transform_2, window_bounds = array<i64: 1, 128>}, {transform_indices = @transform_3, window_bounds = array<i64: 1, 128>}, {transform_indices = @transform_4, window_bounds = array<i64: 16, 1>}, {transform_indices = @transform_5, window_bounds = array<i64: 16, 1>}, {transform_indices = @transform_6, window_bounds = array<i64: 16, 1>}, {transform_indices = @transform_7, window_bounds = array<i64: 16, 1>}, {transform_indices = @transform_8, window_bounds = array<i64: 1, 8, 128>}]} {
    %c0_i32 = arith.constant 0 : i32
    %0 = arith.cmpi eq, %arg1, %c0_i32 : i32
    %1 = arith.extui %0 : i1 to i32
    %c0_i32_0 = arith.constant 0 : i32
    %2 = arith.cmpi ne, %1, %c0_i32_0 : i32
    scf.if %2 {
      %cst_52 = arith.constant 0.000000e+00 : f32
      %77 = vector.broadcast %cst_52 : f32 to vector<16x1xf32>
      %c0_53 = arith.constant 0 : index
      %c0_54 = arith.constant 0 : index
      %78 = vector.load %arg11[%c0_53, %c0_54] : memref<16x1xf32, #tpu.memory_space<vmem>>, vector<16x1xf32>
      tpu.vector_store %arg11[%c0_53, %c0_54], %77 {strides = array<i32>} : memref<16x1xf32, #tpu.memory_space<vmem>>, vector<16x1xf32>,
      %cst_55 = arith.constant 0.000000e+00 : f32
      %79 = vector.broadcast %cst_55 : f32 to vector<16x1xf32>
      %c0_56 = arith.constant 0 : index
      %c0_57 = arith.constant 0 : index
      %80 = vector.load %arg12[%c0_56, %c0_57] : memref<16x1xf32, #tpu.memory_space<vmem>>, vector<16x1xf32>
      tpu.vector_store %arg12[%c0_56, %c0_57], %79 {strides = array<i32>} : memref<16x1xf32, #tpu.memory_space<vmem>>, vector<16x1xf32>,
      %cst_58 = arith.constant 0.000000e+00 : f32
      %81 = vector.broadcast %cst_58 : f32 to vector<1x128xf32>
      %c0_59 = arith.constant 0 : index
      %c0_60 = arith.constant 0 : index
      %82 = vector.load %arg13[%c0_59, %c0_60] : memref<1x128xf32, #tpu.memory_space<vmem>>, vector<1x128xf32>
      tpu.vector_store %arg13[%c0_59, %c0_60], %81 {strides = array<i32>} : memref<1x128xf32, #tpu.memory_space<vmem>>, vector<1x128xf32>,
      %cst_61 = arith.constant 0.000000e+00 : f32
      %83 = vector.broadcast %cst_61 : f32 to vector<1x128xf32>
      %c0_62 = arith.constant 0 : index
      %c0_63 = arith.constant 0 : index
      %84 = vector.load %arg14[%c0_62, %c0_63] : memref<1x128xf32, #tpu.memory_space<vmem>>, vector<1x128xf32>
      tpu.vector_store %arg14[%c0_62, %c0_63], %83 {strides = array<i32>} : memref<1x128xf32, #tpu.memory_space<vmem>>, vector<1x128xf32>,
      %cst_64 = arith.constant 0.000000e+00 : f32
      %85 = vector.broadcast %cst_64 : f32 to vector<1x128xf32>
      %c0_65 = arith.constant 0 : index
      %c0_66 = arith.constant 0 : index
      %86 = vector.load %arg15[%c0_65, %c0_66] : memref<1x128xf32, #tpu.memory_space<vmem>>, vector<1x128xf32>
      tpu.vector_store %arg15[%c0_65, %c0_66], %85 {strides = array<i32>} : memref<1x128xf32, #tpu.memory_space<vmem>>, vector<1x128xf32>,
      %cst_67 = arith.constant 0.000000e+00 : f32
      %87 = vector.broadcast %cst_67 : f32 to vector<1x128xf32>
      %c0_68 = arith.constant 0 : index
      %c0_69 = arith.constant 0 : index
      %88 = vector.load %arg16[%c0_68, %c0_69] : memref<1x128xf32, #tpu.memory_space<vmem>>, vector<1x128xf32>
      tpu.vector_store %arg16[%c0_68, %c0_69], %87 {strides = array<i32>} : memref<1x128xf32, #tpu.memory_space<vmem>>, vector<1x128xf32>,
      %cst_70 = arith.constant 0.000000e+00 : f32
      %89 = vector.broadcast %cst_70 : f32 to vector<1x128xf32>
      %c0_71 = arith.constant 0 : index
      %c0_72 = arith.constant 0 : index
      %90 = vector.load %arg17[%c0_71, %c0_72] : memref<1x128xf32, #tpu.memory_space<vmem>>, vector<1x128xf32>
      tpu.vector_store %arg17[%c0_71, %c0_72], %89 {strides = array<i32>} : memref<1x128xf32, #tpu.memory_space<vmem>>, vector<1x128xf32>,
      %cst_73 = arith.constant 0.000000e+00 : f32
      %91 = vector.broadcast %cst_73 : f32 to vector<1x128xf32>
      %c0_74 = arith.constant 0 : index
      %c0_75 = arith.constant 0 : index
      %92 = vector.load %arg18[%c0_74, %c0_75] : memref<1x128xf32, #tpu.memory_space<vmem>>, vector<1x128xf32>
      tpu.vector_store %arg18[%c0_74, %c0_75], %91 {strides = array<i32>} : memref<1x128xf32, #tpu.memory_space<vmem>>, vector<1x128xf32>,
    } else {
    }
    %c0 = arith.constant 0 : index
    %c0_1 = arith.constant 0 : index
    %3 = vector.load %arg4[%c0, %c0_1] : memref<1x128xf32, #tpu.memory_space<vmem>>, vector<1x128xf32>
    %c0_2 = arith.constant 0 : index
    %c0_3 = arith.constant 0 : index
    %4 = vector.load %arg2[%c0_2, %c0_3] : memref<1x128xf32, #tpu.memory_space<vmem>>, vector<1x128xf32>
    %c0_4 = arith.constant 0 : index
    %c0_5 = arith.constant 0 : index
    %5 = vector.load %arg3[%c0_4, %c0_5] : memref<1x128xf32, #tpu.memory_space<vmem>>, vector<1x128xf32>
    %c0_6 = arith.constant 0 : index
    %c0_7 = arith.constant 0 : index
    %6 = vector.load %arg5[%c0_6, %c0_7] : memref<1x128xf32, #tpu.memory_space<vmem>>, vector<1x128xf32>
    %c0_8 = arith.constant 0 : index
    %c0_9 = arith.constant 0 : index
    %7 = vector.load %arg8[%c0_8, %c0_9] : memref<16x1xf32, #tpu.memory_space<vmem>>, vector<16x1xf32>
    %c0_10 = arith.constant 0 : index
    %c0_11 = arith.constant 0 : index
    %8 = vector.load %arg6[%c0_10, %c0_11] : memref<16x1xf32, #tpu.memory_space<vmem>>, vector<16x1xf32>
    %c0_12 = arith.constant 0 : index
    %c0_13 = arith.constant 0 : index
    %9 = vector.load %arg7[%c0_12, %c0_13] : memref<16x1xf32, #tpu.memory_space<vmem>>, vector<16x1xf32>
    %c0_14 = arith.constant 0 : index
    %c0_15 = arith.constant 0 : index
    %10 = vector.load %arg9[%c0_14, %c0_15] : memref<16x1xf32, #tpu.memory_space<vmem>>, vector<16x1xf32>
    %cst = arith.constant 0.000000e+00 : f32
    %11 = vector.broadcast %cst : f32 to vector<1x128xf32>
    %12 = arith.cmpf oeq, %5, %11 : vector<1x128xf32>
    %cst_16 = arith.constant 5.000000e-01 : f32
    %13 = vector.broadcast %cst_16 : f32 to vector<1x128xf32>
    %14 = arith.cmpf ogt, %6, %13 : vector<1x128xf32>
    %15 = arith.andi %12, %14 : vector<1x128xi1>
    %cst_17 = arith.constant 1.000000e+00 : f32
    %cst_18 = arith.constant 0.000000e+00 : f32
    %16 = vector.broadcast %cst_17 : f32 to vector<1x128xf32>
    %17 = vector.broadcast %cst_18 : f32 to vector<1x128xf32>
    %18 = arith.select %15, %16, %17 : vector<1x128xi1>, vector<1x128xf32>
    %cst_19 = arith.constant 0.000000e+00 : f32
    %19 = vector.broadcast %cst_19 : f32 to vector<16x1xf32>
    %20 = arith.cmpf oeq, %9, %19 : vector<16x1xf32>
    %cst_20 = arith.constant 5.000000e-01 : f32
    %21 = vector.broadcast %cst_20 : f32 to vector<16x1xf32>
    %22 = arith.cmpf ogt, %10, %21 : vector<16x1xf32>
    %23 = arith.andi %20, %22 : vector<16x1xi1>
    %cst_21 = arith.constant 1.000000e+00 : f32
    %cst_22 = arith.constant 0.000000e+00 : f32
    %24 = vector.broadcast %cst_21 : f32 to vector<16x1xf32>
    %25 = vector.broadcast %cst_22 : f32 to vector<16x1xf32>
    %26 = arith.select %23, %24, %25 : vector<16x1xi1>, vector<16x1xf32>
    %27 = vector.broadcast %7 : vector<16x1xf32> to vector<16x128xf32>
    %28 = vector.broadcast %3 : vector<1x128xf32> to vector<16x128xf32>
    %29 = arith.subf %27, %28 : vector<16x128xf32>
    %30 = math.absf %29 : vector<16x128xf32>
    %31 = vector.broadcast %18 : vector<1x128xf32> to vector<16x128xf32>
    %32 = arith.mulf %30, %31 : vector<16x128xf32>
    %33 = vector.broadcast %8 : vector<16x1xf32> to vector<16x128xf32>
    %34 = vector.broadcast %4 : vector<1x128xf32> to vector<16x128xf32>
    %35 = arith.subf %33, %34 : vector<16x128xf32>
    %36 = math.absf %35 : vector<16x128xf32>
    %37 = vector.broadcast %18 : vector<1x128xf32> to vector<16x128xf32>
    %38 = arith.mulf %36, %37 : vector<16x128xf32>
    %c0_23 = arith.constant 0 : index
    %c0_24 = arith.constant 0 : index
    %39 = vector.load %arg11[%c0_23, %c0_24] : memref<16x1xf32, #tpu.memory_space<vmem>>, vector<16x1xf32>
    %cst_25 = arith.constant dense<0.000000e+00> : vector<16xf32>
    %40 = vector.multi_reduction <add>, %32, %cst_25 [1] : vector<16x128xf32> to vector<16xf32>
    %41 = vector.shape_cast %40 : vector<16xf32> to vector<16x1xf32>
    %42 = arith.addf %39, %41 : vector<16x1xf32>
    %c0_26 = arith.constant 0 : index
    %c0_27 = arith.constant 0 : index
    %43 = vector.load %arg11[%c0_26, %c0_27] : memref<16x1xf32, #tpu.memory_space<vmem>>, vector<16x1xf32>
    tpu.vector_store %arg11[%c0_26, %c0_27], %42 {strides = array<i32>} : memref<16x1xf32, #tpu.memory_space<vmem>>, vector<16x1xf32>,
    %c0_28 = arith.constant 0 : index
    %c0_29 = arith.constant 0 : index
    %44 = vector.load %arg12[%c0_28, %c0_29] : memref<16x1xf32, #tpu.memory_space<vmem>>, vector<16x1xf32>
    %cst_30 = arith.constant dense<0.000000e+00> : vector<16xf32>
    %45 = vector.multi_reduction <add>, %38, %cst_30 [1] : vector<16x128xf32> to vector<16xf32>
    %46 = vector.shape_cast %45 : vector<16xf32> to vector<16x1xf32>
    %47 = arith.addf %44, %46 : vector<16x1xf32>
    %c0_31 = arith.constant 0 : index
    %c0_32 = arith.constant 0 : index
    %48 = vector.load %arg12[%c0_31, %c0_32] : memref<16x1xf32, #tpu.memory_space<vmem>>, vector<16x1xf32>
    tpu.vector_store %arg12[%c0_31, %c0_32], %47 {strides = array<i32>} : memref<16x1xf32, #tpu.memory_space<vmem>>, vector<16x1xf32>,
    %49 = vector.broadcast %26 : vector<16x1xf32> to vector<16x128xf32>
    %50 = arith.mulf %32, %49 : vector<16x128xf32>
    %c0_33 = arith.constant 0 : index
    %c0_34 = arith.constant 0 : index
    %51 = vector.load %arg13[%c0_33, %c0_34] : memref<1x128xf32, #tpu.memory_space<vmem>>, vector<1x128xf32>
    %52 = arith.mulf %50, %32 : vector<16x128xf32>
    %cst_35 = arith.constant dense<0.000000e+00> : vector<128xf32>
    %53 = vector.multi_reduction <add>, %52, %cst_35 [0] : vector<16x128xf32> to vector<128xf32>
    %54 = vector.shape_cast %53 : vector<128xf32> to vector<1x128xf32>
    %55 = arith.addf %51, %54 : vector<1x128xf32>
    %c0_36 = arith.constant 0 : index
    %c0_37 = arith.constant 0 : index
    %56 = vector.load %arg13[%c0_36, %c0_37] : memref<1x128xf32, #tpu.memory_space<vmem>>, vector<1x128xf32>
    tpu.vector_store %arg13[%c0_36, %c0_37], %55 {strides = array<i32>} : memref<1x128xf32, #tpu.memory_space<vmem>>, vector<1x128xf32>,
    %c0_38 = arith.constant 0 : index
    %c0_39 = arith.constant 0 : index
    %57 = vector.load %arg14[%c0_38, %c0_39] : memref<1x128xf32, #tpu.memory_space<vmem>>, vector<1x128xf32>
    %58 = arith.mulf %50, %38 : vector<16x128xf32>
    %cst_40 = arith.constant dense<0.000000e+00> : vector<128xf32>
    %59 = vector.multi_reduction <add>, %58, %cst_40 [0] : vector<16x128xf32> to vector<128xf32>
    %60 = vector.shape_cast %59 : vector<128xf32> to vector<1x128xf32>
    %61 = arith.addf %57, %60 : vector<1x128xf32>
    %c0_41 = arith.constant 0 : index
    %c0_42 = arith.constant 0 : index
    %62 = vector.load %arg14[%c0_41, %c0_42] : memref<1x128xf32, #tpu.memory_space<vmem>>, vector<1x128xf32>
    tpu.vector_store %arg14[%c0_41, %c0_42], %61 {strides = array<i32>} : memref<1x128xf32, #tpu.memory_space<vmem>>, vector<1x128xf32>,
    %c0_43 = arith.constant 0 : index
    %c0_44 = arith.constant 0 : index
    %63 = vector.load %arg15[%c0_43, %c0_44] : memref<1x128xf32, #tpu.memory_space<vmem>>, vector<1x128xf32>
    %64 = vector.broadcast %26 : vector<16x1xf32> to vector<16x128xf32>
    %65 = arith.mulf %64, %38 : vector<16x128xf32>
    %66 = arith.mulf %65, %38 : vector<16x128xf32>
    %cst_45 = arith.constant dense<0.000000e+00> : vector<128xf32>
    %67 = vector.multi_reduction <add>, %66, %cst_45 [0] : vector<16x128xf32> to vector<128xf32>
    %68 = vector.shape_cast %67 : vector<128xf32> to vector<1x128xf32>
    %69 = arith.addf %63, %68 : vector<1x128xf32>
    %c0_46 = arith.constant 0 : index
    %c0_47 = arith.constant 0 : index
    %70 = vector.load %arg15[%c0_46, %c0_47] : memref<1x128xf32, #tpu.memory_space<vmem>>, vector<1x128xf32>
    tpu.vector_store %arg15[%c0_46, %c0_47], %69 {strides = array<i32>} : memref<1x128xf32, #tpu.memory_space<vmem>>, vector<1x128xf32>,
    %c0_i32_48 = arith.constant 0 : i32
    %71 = arith.cmpi eq, %arg0, %c0_i32_48 : i32
    %72 = arith.extui %71 : i1 to i32
    %c0_i32_49 = arith.constant 0 : i32
    %73 = arith.cmpi ne, %72, %c0_i32_49 : i32
    scf.if %73 {
      %cst_52 = arith.constant 1.200000e+02 : f32
      %77 = vector.broadcast %cst_52 : f32 to vector<1x128xf32>
      %78 = arith.cmpf ogt, %3, %77 : vector<1x128xf32>
      %cst_53 = arith.constant 1.300000e+02 : f32
      %79 = vector.broadcast %cst_53 : f32 to vector<1x128xf32>
      %80 = arith.cmpf olt, %3, %79 : vector<1x128xf32>
      %81 = arith.andi %78, %80 : vector<1x128xi1>
      %cst_54 = arith.constant 5.000000e-01 : f32
      %82 = vector.broadcast %cst_54 : f32 to vector<1x128xf32>
      %83 = arith.cmpf ogt, %6, %82 : vector<1x128xf32>
      %84 = arith.andi %81, %83 : vector<1x128xi1>
      %cst_55 = arith.constant 1.000000e+00 : f32
      %cst_56 = arith.constant 0.000000e+00 : f32
      %85 = vector.broadcast %cst_55 : f32 to vector<1x128xf32>
      %86 = vector.broadcast %cst_56 : f32 to vector<1x128xf32>
      %87 = arith.select %84, %85, %86 : vector<1x128xi1>, vector<1x128xf32>
      %88 = math.log %4 : vector<1x128xf32>
      %cst_57 = arith.constant -1.000000e+02 : f32
      %89 = vector.broadcast %cst_57 : f32 to vector<1x128xf32>
      %90 = arith.maximumf %88, %89 : vector<1x128xf32>
      %cst_58 = arith.constant 1.000000e+00 : f32
      %91 = vector.broadcast %cst_58 : f32 to vector<1x128xf32>
      %92 = arith.subf %91, %4 : vector<1x128xf32>
      %93 = math.log %92 : vector<1x128xf32>
      %cst_59 = arith.constant -1.000000e+02 : f32
      %94 = vector.broadcast %cst_59 : f32 to vector<1x128xf32>
      %95 = arith.maximumf %93, %94 : vector<1x128xf32>
      %96 = arith.mulf %5, %90 : vector<1x128xf32>
      %cst_60 = arith.constant 1.000000e+00 : f32
      %97 = vector.broadcast %cst_60 : f32 to vector<1x128xf32>
      %98 = arith.subf %97, %5 : vector<1x128xf32>
      %99 = arith.mulf %98, %95 : vector<1x128xf32>
      %100 = arith.addf %96, %99 : vector<1x128xf32>
      %cst_61 = arith.constant 0.000000e+00 : f32
      %101 = vector.broadcast %cst_61 : f32 to vector<1x128xf32>
      %102 = arith.subf %101, %100 : vector<1x128xf32>
      %c0_62 = arith.constant 0 : index
      %c0_63 = arith.constant 0 : index
      %103 = vector.load %arg16[%c0_62, %c0_63] : memref<1x128xf32, #tpu.memory_space<vmem>>, vector<1x128xf32>
      %104 = arith.mulf %102, %87 : vector<1x128xf32>
      %105 = arith.addf %103, %104 : vector<1x128xf32>
      %c0_64 = arith.constant 0 : index
      %c0_65 = arith.constant 0 : index
      %106 = vector.load %arg16[%c0_64, %c0_65] : memref<1x128xf32, #tpu.memory_space<vmem>>, vector<1x128xf32>
      tpu.vector_store %arg16[%c0_64, %c0_65], %105 {strides = array<i32>} : memref<1x128xf32, #tpu.memory_space<vmem>>, vector<1x128xf32>,
      %c0_66 = arith.constant 0 : index
      %c0_67 = arith.constant 0 : index
      %107 = vector.load %arg17[%c0_66, %c0_67] : memref<1x128xf32, #tpu.memory_space<vmem>>, vector<1x128xf32>
      %108 = arith.addf %107, %87 : vector<1x128xf32>
      %c0_68 = arith.constant 0 : index
      %c0_69 = arith.constant 0 : index
      %109 = vector.load %arg17[%c0_68, %c0_69] : memref<1x128xf32, #tpu.memory_space<vmem>>, vector<1x128xf32>
      tpu.vector_store %arg17[%c0_68, %c0_69], %108 {strides = array<i32>} : memref<1x128xf32, #tpu.memory_space<vmem>>, vector<1x128xf32>,
      %c0_70 = arith.constant 0 : index
      %c0_71 = arith.constant 0 : index
      %110 = vector.load %arg18[%c0_70, %c0_71] : memref<1x128xf32, #tpu.memory_space<vmem>>, vector<1x128xf32>
      %111 = arith.addf %110, %18 : vector<1x128xf32>
      %c0_72 = arith.constant 0 : index
      %c0_73 = arith.constant 0 : index
      %112 = vector.load %arg18[%c0_72, %c0_73] : memref<1x128xf32, #tpu.memory_space<vmem>>, vector<1x128xf32>
      tpu.vector_store %arg18[%c0_72, %c0_73], %111 {strides = array<i32>} : memref<1x128xf32, #tpu.memory_space<vmem>>, vector<1x128xf32>,
    } else {
    }
    %c0_i32_50 = arith.constant 0 : i32
    %74 = arith.cmpi eq, %arg1, %c0_i32_50 : i32
    %75 = arith.extui %74 : i1 to i32
    %c0_i32_51 = arith.constant 0 : i32
    %76 = arith.cmpi ne, %75, %c0_i32_51 : i32
    scf.if %76 {
      %c0_52 = arith.constant 0 : index
      %c0_53 = arith.constant 0 : index
      %77 = vector.load %arg11[%c0_52, %c0_53] : memref<16x1xf32, #tpu.memory_space<vmem>>, vector<16x1xf32>
      %c0_54 = arith.constant 0 : index
      %c0_55 = arith.constant 0 : index
      %78 = vector.load %arg12[%c0_54, %c0_55] : memref<16x1xf32, #tpu.memory_space<vmem>>, vector<16x1xf32>
      %79 = arith.mulf %26, %77 : vector<16x1xf32>
      %80 = arith.mulf %26, %78 : vector<16x1xf32>
      %c0_56 = arith.constant 0 : index
      %c0_57 = arith.constant 0 : index
      %81 = vector.load %arg13[%c0_56, %c0_57] : memref<1x128xf32, #tpu.memory_space<vmem>>, vector<1x128xf32>
      %82 = vector.shape_cast %81 : vector<1x128xf32> to vector<1x1x128xf32>
      %cst_58 = arith.constant dense<0.000000e+00> : vector<1xf32>
      %83 = vector.multi_reduction <add>, %82, %cst_58 [1, 2] : vector<1x1x128xf32> to vector<1xf32>
      %84 = vector.shape_cast %83 : vector<1xf32> to vector<1x1x1xf32>
      %85 = vector.extract %84[0, 0, 0] : f32 from vector<1x1x1xf32>
      %c0_59 = arith.constant 0 : index
      %c0_60 = arith.constant 0 : index
      %86 = vector.load %arg14[%c0_59, %c0_60] : memref<1x128xf32, #tpu.memory_space<vmem>>, vector<1x128xf32>
      %87 = vector.shape_cast %86 : vector<1x128xf32> to vector<1x1x128xf32>
      %cst_61 = arith.constant dense<0.000000e+00> : vector<1xf32>
      %88 = vector.multi_reduction <add>, %87, %cst_61 [1, 2] : vector<1x1x128xf32> to vector<1xf32>
      %89 = vector.shape_cast %88 : vector<1xf32> to vector<1x1x1xf32>
      %90 = vector.extract %89[0, 0, 0] : f32 from vector<1x1x1xf32>
      %c0_62 = arith.constant 0 : index
      %c0_63 = arith.constant 0 : index
      %91 = vector.load %arg15[%c0_62, %c0_63] : memref<1x128xf32, #tpu.memory_space<vmem>>, vector<1x128xf32>
      %92 = vector.shape_cast %91 : vector<1x128xf32> to vector<1x1x128xf32>
      %cst_64 = arith.constant dense<0.000000e+00> : vector<1xf32>
      %93 = vector.multi_reduction <add>, %92, %cst_64 [1, 2] : vector<1x1x128xf32> to vector<1xf32>
      %94 = vector.shape_cast %93 : vector<1xf32> to vector<1x1x1xf32>
      %95 = vector.extract %94[0, 0, 0] : f32 from vector<1x1x1xf32>
      %96 = arith.mulf %79, %77 : vector<16x1xf32>
      %97 = vector.shape_cast %96 : vector<16x1xf32> to vector<1x16x1xf32>
      %cst_65 = arith.constant dense<0.000000e+00> : vector<1xf32>
      %98 = vector.multi_reduction <add>, %97, %cst_65 [1, 2] : vector<1x16x1xf32> to vector<1xf32>
      %99 = vector.shape_cast %98 : vector<1xf32> to vector<1x1x1xf32>
      %100 = vector.extract %99[0, 0, 0] : f32 from vector<1x1x1xf32>
      %101 = arith.mulf %79, %78 : vector<16x1xf32>
      %102 = vector.shape_cast %101 : vector<16x1xf32> to vector<1x16x1xf32>
      %cst_66 = arith.constant dense<0.000000e+00> : vector<1xf32>
      %103 = vector.multi_reduction <add>, %102, %cst_66 [1, 2] : vector<1x16x1xf32> to vector<1xf32>
      %104 = vector.shape_cast %103 : vector<1xf32> to vector<1x1x1xf32>
      %105 = vector.extract %104[0, 0, 0] : f32 from vector<1x1x1xf32>
      %106 = arith.mulf %80, %78 : vector<16x1xf32>
      %107 = vector.shape_cast %106 : vector<16x1xf32> to vector<1x16x1xf32>
      %cst_67 = arith.constant dense<0.000000e+00> : vector<1xf32>
      %108 = vector.multi_reduction <add>, %107, %cst_67 [1, 2] : vector<1x16x1xf32> to vector<1xf32>
      %109 = vector.shape_cast %108 : vector<1xf32> to vector<1x1x1xf32>
      %110 = vector.extract %109[0, 0, 0] : f32 from vector<1x1x1xf32>
      %111 = vector.shape_cast %79 : vector<16x1xf32> to vector<1x16x1xf32>
      %cst_68 = arith.constant dense<0.000000e+00> : vector<1xf32>
      %112 = vector.multi_reduction <add>, %111, %cst_68 [1, 2] : vector<1x16x1xf32> to vector<1xf32>
      %113 = vector.shape_cast %112 : vector<1xf32> to vector<1x1x1xf32>
      %114 = vector.extract %113[0, 0, 0] : f32 from vector<1x1x1xf32>
      %115 = vector.shape_cast %80 : vector<16x1xf32> to vector<1x16x1xf32>
      %cst_69 = arith.constant dense<0.000000e+00> : vector<1xf32>
      %116 = vector.multi_reduction <add>, %115, %cst_69 [1, 2] : vector<1x16x1xf32> to vector<1xf32>
      %117 = vector.shape_cast %116 : vector<1xf32> to vector<1x1x1xf32>
      %118 = vector.extract %117[0, 0, 0] : f32 from vector<1x1x1xf32>
      %c0_70 = arith.constant 0 : index
      %c0_71 = arith.constant 0 : index
      %119 = vector.load %arg16[%c0_70, %c0_71] : memref<1x128xf32, #tpu.memory_space<vmem>>, vector<1x128xf32>
      %120 = vector.shape_cast %119 : vector<1x128xf32> to vector<1x1x128xf32>
      %cst_72 = arith.constant dense<0.000000e+00> : vector<1xf32>
      %121 = vector.multi_reduction <add>, %120, %cst_72 [1, 2] : vector<1x1x128xf32> to vector<1xf32>
      %122 = vector.shape_cast %121 : vector<1xf32> to vector<1x1x1xf32>
      %123 = vector.extract %122[0, 0, 0] : f32 from vector<1x1x1xf32>
      %c0_73 = arith.constant 0 : index
      %c0_74 = arith.constant 0 : index
      %124 = vector.load %arg17[%c0_73, %c0_74] : memref<1x128xf32, #tpu.memory_space<vmem>>, vector<1x128xf32>
      %125 = vector.shape_cast %124 : vector<1x128xf32> to vector<1x1x128xf32>
      %cst_75 = arith.constant dense<0.000000e+00> : vector<1xf32>
      %126 = vector.multi_reduction <add>, %125, %cst_75 [1, 2] : vector<1x1x128xf32> to vector<1xf32>
      %127 = vector.shape_cast %126 : vector<1xf32> to vector<1x1x1xf32>
      %128 = vector.extract %127[0, 0, 0] : f32 from vector<1x1x1xf32>
      %c0_76 = arith.constant 0 : index
      %c0_77 = arith.constant 0 : index
      %129 = vector.load %arg18[%c0_76, %c0_77] : memref<1x128xf32, #tpu.memory_space<vmem>>, vector<1x128xf32>
      %130 = vector.shape_cast %129 : vector<1x128xf32> to vector<1x1x128xf32>
      %cst_78 = arith.constant dense<0.000000e+00> : vector<1xf32>
      %131 = vector.multi_reduction <add>, %130, %cst_78 [1, 2] : vector<1x1x128xf32> to vector<1xf32>
      %132 = vector.shape_cast %131 : vector<1xf32> to vector<1x1x1xf32>
      %133 = vector.extract %132[0, 0, 0] : f32 from vector<1x1x1xf32>
      %134 = tpu.iota {dimensions = array<i32: 2>} : vector<1x8x128xi32>
      %cst_79 = arith.constant 0.000000e+00 : f32
      %135 = vector.broadcast %cst_79 : f32 to vector<1x8x128xf32>
      %c0_i32_80 = arith.constant 0 : i32
      %136 = vector.broadcast %c0_i32_80 : i32 to vector<1x8x128xi32>
      %137 = arith.cmpi eq, %134, %136 : vector<1x8x128xi32>
      %cst_81 = arith.constant 0.000000e+00 : f32
      %138 = vector.broadcast %85 : f32 to vector<1x8x128xf32>
      %139 = vector.broadcast %cst_81 : f32 to vector<1x8x128xf32>
      %140 = arith.select %137, %138, %139 : vector<1x8x128xi1>, vector<1x8x128xf32>
      %141 = arith.addf %135, %140 : vector<1x8x128xf32>
      %c1_i32 = arith.constant 1 : i32
      %142 = vector.broadcast %c1_i32 : i32 to vector<1x8x128xi32>
      %143 = arith.cmpi eq, %134, %142 : vector<1x8x128xi32>
      %cst_82 = arith.constant 0.000000e+00 : f32
      %144 = vector.broadcast %90 : f32 to vector<1x8x128xf32>
      %145 = vector.broadcast %cst_82 : f32 to vector<1x8x128xf32>
      %146 = arith.select %143, %144, %145 : vector<1x8x128xi1>, vector<1x8x128xf32>
      %147 = arith.addf %141, %146 : vector<1x8x128xf32>
      %c2_i32 = arith.constant 2 : i32
      %148 = vector.broadcast %c2_i32 : i32 to vector<1x8x128xi32>
      %149 = arith.cmpi eq, %134, %148 : vector<1x8x128xi32>
      %cst_83 = arith.constant 0.000000e+00 : f32
      %150 = vector.broadcast %95 : f32 to vector<1x8x128xf32>
      %151 = vector.broadcast %cst_83 : f32 to vector<1x8x128xf32>
      %152 = arith.select %149, %150, %151 : vector<1x8x128xi1>, vector<1x8x128xf32>
      %153 = arith.addf %147, %152 : vector<1x8x128xf32>
      %c3_i32 = arith.constant 3 : i32
      %154 = vector.broadcast %c3_i32 : i32 to vector<1x8x128xi32>
      %155 = arith.cmpi eq, %134, %154 : vector<1x8x128xi32>
      %cst_84 = arith.constant 0.000000e+00 : f32
      %156 = vector.broadcast %100 : f32 to vector<1x8x128xf32>
      %157 = vector.broadcast %cst_84 : f32 to vector<1x8x128xf32>
      %158 = arith.select %155, %156, %157 : vector<1x8x128xi1>, vector<1x8x128xf32>
      %159 = arith.addf %153, %158 : vector<1x8x128xf32>
      %c4_i32 = arith.constant 4 : i32
      %160 = vector.broadcast %c4_i32 : i32 to vector<1x8x128xi32>
      %161 = arith.cmpi eq, %134, %160 : vector<1x8x128xi32>
      %cst_85 = arith.constant 0.000000e+00 : f32
      %162 = vector.broadcast %105 : f32 to vector<1x8x128xf32>
      %163 = vector.broadcast %cst_85 : f32 to vector<1x8x128xf32>
      %164 = arith.select %161, %162, %163 : vector<1x8x128xi1>, vector<1x8x128xf32>
      %165 = arith.addf %159, %164 : vector<1x8x128xf32>
      %c5_i32 = arith.constant 5 : i32
      %166 = vector.broadcast %c5_i32 : i32 to vector<1x8x128xi32>
      %167 = arith.cmpi eq, %134, %166 : vector<1x8x128xi32>
      %cst_86 = arith.constant 0.000000e+00 : f32
      %168 = vector.broadcast %110 : f32 to vector<1x8x128xf32>
      %169 = vector.broadcast %cst_86 : f32 to vector<1x8x128xf32>
      %170 = arith.select %167, %168, %169 : vector<1x8x128xi1>, vector<1x8x128xf32>
      %171 = arith.addf %165, %170 : vector<1x8x128xf32>
      %c6_i32 = arith.constant 6 : i32
      %172 = vector.broadcast %c6_i32 : i32 to vector<1x8x128xi32>
      %173 = arith.cmpi eq, %134, %172 : vector<1x8x128xi32>
      %cst_87 = arith.constant 0.000000e+00 : f32
      %174 = vector.broadcast %114 : f32 to vector<1x8x128xf32>
      %175 = vector.broadcast %cst_87 : f32 to vector<1x8x128xf32>
      %176 = arith.select %173, %174, %175 : vector<1x8x128xi1>, vector<1x8x128xf32>
      %177 = arith.addf %171, %176 : vector<1x8x128xf32>
      %c7_i32 = arith.constant 7 : i32
      %178 = vector.broadcast %c7_i32 : i32 to vector<1x8x128xi32>
      %179 = arith.cmpi eq, %134, %178 : vector<1x8x128xi32>
      %cst_88 = arith.constant 0.000000e+00 : f32
      %180 = vector.broadcast %118 : f32 to vector<1x8x128xf32>
      %181 = vector.broadcast %cst_88 : f32 to vector<1x8x128xf32>
      %182 = arith.select %179, %180, %181 : vector<1x8x128xi1>, vector<1x8x128xf32>
      %183 = arith.addf %177, %182 : vector<1x8x128xf32>
      %c8_i32 = arith.constant 8 : i32
      %184 = vector.broadcast %c8_i32 : i32 to vector<1x8x128xi32>
      %185 = arith.cmpi eq, %134, %184 : vector<1x8x128xi32>
      %cst_89 = arith.constant 0.000000e+00 : f32
      %186 = vector.broadcast %123 : f32 to vector<1x8x128xf32>
      %187 = vector.broadcast %cst_89 : f32 to vector<1x8x128xf32>
      %188 = arith.select %185, %186, %187 : vector<1x8x128xi1>, vector<1x8x128xf32>
      %189 = arith.addf %183, %188 : vector<1x8x128xf32>
      %c9_i32 = arith.constant 9 : i32
      %190 = vector.broadcast %c9_i32 : i32 to vector<1x8x128xi32>
      %191 = arith.cmpi eq, %134, %190 : vector<1x8x128xi32>
      %cst_90 = arith.constant 0.000000e+00 : f32
      %192 = vector.broadcast %128 : f32 to vector<1x8x128xf32>
      %193 = vector.broadcast %cst_90 : f32 to vector<1x8x128xf32>
      %194 = arith.select %191, %192, %193 : vector<1x8x128xi1>, vector<1x8x128xf32>
      %195 = arith.addf %189, %194 : vector<1x8x128xf32>
      %c10_i32 = arith.constant 10 : i32
      %196 = vector.broadcast %c10_i32 : i32 to vector<1x8x128xi32>
      %197 = arith.cmpi eq, %134, %196 : vector<1x8x128xi32>
      %cst_91 = arith.constant 0.000000e+00 : f32
      %198 = vector.broadcast %133 : f32 to vector<1x8x128xf32>
      %199 = vector.broadcast %cst_91 : f32 to vector<1x8x128xf32>
      %200 = arith.select %197, %198, %199 : vector<1x8x128xi1>, vector<1x8x128xf32>
      %201 = arith.addf %195, %200 : vector<1x8x128xf32>
      %c0_92 = arith.constant 0 : index
      %c0_93 = arith.constant 0 : index
      %c0_94 = arith.constant 0 : index
      %202 = vector.load %arg10[%c0_92, %c0_93, %c0_94] : memref<1x8x128xf32, #tpu.memory_space<vmem>>, vector<1x8x128xf32>
      tpu.vector_store %arg10[%c0_92, %c0_93, %c0_94], %201 {strides = array<i32>} : memref<1x8x128xf32, #tpu.memory_space<vmem>>, vector<1x8x128xf32>,
    } else {
    }
    return
  }
  func.func @transform_0(%arg0: i32, %arg1: i32) -> (i32, i32) {
    %c0_i32 = arith.constant 0 : i32
    %c0_i32_0 = arith.constant 0 : i32
    return %c0_i32, %arg1 : i32, i32
  }
  func.func @transform_1(%arg0: i32, %arg1: i32) -> (i32, i32) {
    %c0_i32 = arith.constant 0 : i32
    %c0_i32_0 = arith.constant 0 : i32
    return %c0_i32, %arg1 : i32, i32
  }
  func.func @transform_2(%arg0: i32, %arg1: i32) -> (i32, i32) {
    %c0_i32 = arith.constant 0 : i32
    %c0_i32_0 = arith.constant 0 : i32
    return %c0_i32, %arg1 : i32, i32
  }
  func.func @transform_3(%arg0: i32, %arg1: i32) -> (i32, i32) {
    %c0_i32 = arith.constant 0 : i32
    %c0_i32_0 = arith.constant 0 : i32
    return %c0_i32, %arg1 : i32, i32
  }
  func.func @transform_4(%arg0: i32, %arg1: i32) -> (i32, i32) {
    %c0_i32 = arith.constant 0 : i32
    %c0_i32_0 = arith.constant 0 : i32
    return %arg0, %c0_i32 : i32, i32
  }
  func.func @transform_5(%arg0: i32, %arg1: i32) -> (i32, i32) {
    %c0_i32 = arith.constant 0 : i32
    %c0_i32_0 = arith.constant 0 : i32
    return %arg0, %c0_i32 : i32, i32
  }
  func.func @transform_6(%arg0: i32, %arg1: i32) -> (i32, i32) {
    %c0_i32 = arith.constant 0 : i32
    %c0_i32_0 = arith.constant 0 : i32
    return %arg0, %c0_i32 : i32, i32
  }
  func.func @transform_7(%arg0: i32, %arg1: i32) -> (i32, i32) {
    %c0_i32 = arith.constant 0 : i32
    %c0_i32_0 = arith.constant 0 : i32
    return %arg0, %c0_i32 : i32, i32
  }
  func.func @transform_8(%arg0: i32, %arg1: i32) -> (i32, i32, i32) {
    %c0_i32 = arith.constant 0 : i32
    %c0_i32_0 = arith.constant 0 : i32
    %c0_i32_1 = arith.constant 0 : i32
    return %arg0, %c0_i32, %c0_i32_0 : i32, i32, i32
  }
}

</mosaic_0001>

<bundles_post_ra>
// kernel: tpu_custom_call.1
= control target key start
LH: loop header
LB: loop body
LE: loop exit
PB: predicated region body
PF: predicated region fallthrough
CT: control target
= control target key end

     0   :  { %v486_v2 = vmov 0   ;;  %v487_v5 = vmov 0.0   ;;  %s634_s0 = inlined_call_operand.vmem [shape: f32[1,128], index: 0, kind: input, shape index: {}]   ;;  %s635_s1 = inlined_call_operand.vmem [shape: f32[1,128], index: 1, kind: input, shape index: {}]   ;;  %s636_s2 = inlined_call_operand.vmem [shape: f32[1,128], index: 2, kind: input, shape index: {}]   ;;  %s637_s3 = inlined_call_operand.vmem [shape: f32[1,128], index: 3, kind: input, shape index: {}]   ;;  %s638_s4 = inlined_call_operand.vmem [shape: f32[16,1], index: 4, kind: input, shape index: {}]   ;;  %s639_s5 = inlined_call_operand.vmem [shape: f32[16,1], index: 5, kind: input, shape index: {}]   ;;  %s640_s6 = inlined_call_operand.vmem [shape: f32[16,1], index: 6, kind: input, shape index: {}]   ;;  %s641_s7 = inlined_call_operand.vmem [shape: f32[16,1], index: 7, kind: input, shape index: {}]   ;;  %s642_s8 = inlined_call_operand.hbm [shape: f32[1,8,128], index: 8, kind: output, shape index: {}]  }
   0x1   :  { %v51_v0 = vld [vmem:[%s638_s4] sm:$0xff]  ;;  %452 = vset.pattern.permute.xlu1 %v486_v2  ;;  %451 = vset.pattern.permute.xlu0 %v486_v2  ;;  %v54_v4 = vld [vmem:[%s639_s5 + $0x8] sm:$0xff]  ;;  %39 = vst [vmem:[#allocation4] sm:$0x1] %v487_v5  ;;  %40 = vst [vmem:[#allocation5] sm:$0x1] %v487_v5 }
   0x2   :  { %v49_v1 = vld [vmem:[%s640_s6] sm:$0xff]  ;;  %41 = vst [vmem:[#allocation6] sm:$0x1] %v487_v5  ;;  %42 = vst [vmem:[#allocation7] sm:$0x1] %v487_v5  ;;  %99 = vperm.xlu1 %452, %v51_v0   ;;  %v56_v7 = vld [vmem:[%s641_s7 + $0x8] sm:$0xff] }
   0x3   :  { %v53_v3 = vld [vmem:[%s639_s5] sm:$0xff]  ;;  %43 = vst [vmem:[#allocation8] sm:$0x1] %v487_v5  ;;  %44 = vst [vmem:[#allocation9] sm:$0x1] %v487_v5  ;;  %71 = vperm.xlu0 %451, %v49_v1   ;;  %vm62_vm1 = vcmp.eq.f32.partialorder %v54_v4, 0.0 }
   0x4   :  { %v55_v6 = vld [vmem:[%s641_s7] sm:$0xff]  ;;  %vm61_vm0 = vcmp.eq.f32.partialorder %v53_v3, 0.0  ;;  %v52_v8 = vld [vmem:[%s638_s4 + $0x8] sm:$0xff]  ;;  %vm64_vm3 = vcmp.gt.f32.partialorder %v56_v7, 0.5 }
   0x5   :  { %v50_v9 = vld [vmem:[%s640_s6 + $0x8] sm:$0xff]  ;;  %vm63_vm2 = vcmp.gt.f32.partialorder %v55_v6, 0.5  ;;  %v47_v10 = vld [vmem:[%s635_s1] sm:$0x1]  ;;  %vm66_vm6 = vmand %vm62_vm1, %vm64_vm3 }
   0x6   :  { %vm65_vm4 = vmand %vm61_vm0, %vm63_vm2  ;;  %v48_v11 = vld [vmem:[%s637_s3] sm:$0x1]  ;;  %vm57_vm5 = vcmp.eq.f32.partialorder %v47_v10, 0.0  ;;  %104 = vperm.xlu1 %452, %v52_v8   ;;  %v577_v14 = vsel %vm66_vm6, 1.0, %v487_v5 }
   0x7   :  { %v571_v12 = vsel %vm65_vm4, 1.0, %v487_v5  ;;  %v46_v13 = vld [vmem:[%s634_s0] sm:$0x1]  ;;  %vm58_vm7 = vcmp.gt.f32.partialorder %v48_v11, 0.5  ;;  %76 = vperm.xlu0 %451, %v50_v9  }
   0x8   :  { %vm59_vm8 = vmand %vm57_vm5, %vm58_vm7  ;;  %458 = vlog2.f32 %v46_v13  ;;  %v202_v15 = vsub.f32 1.0, %v46_v13  ;;  %v453_v16 = vpack.i.bf16 %v577_v14, %v571_v12  ;;  %v45_v17 = vld [vmem:[%s636_s2] sm:$0x1] }
   0x9   :  { %13 = vsyncpa [#allocation11], 0  ;;  %v60_v18 = vsel %vm59_vm8, 1.0, %v487_v5  ;;  %vm194_vm9 = vcmp.gt.f32.partialorder %v45_v17, 120.0  ;;  %vm195_vm10 = vcmp.lt.f32.partialorder %v45_v17, 130.0  ;;  %v207_v29 = vsub.f32 1.0, %v47_v10 }
   0xa   :  { %460 = vlog2.f32 %v202_v15  ;;  %v218_v19 = vld [vmem:[#allocation9] sm:$0x1]  ;;  %vm196_vm11 = vmand %vm194_vm9, %vm195_vm10  ;;  %v215_v21 = vld [vmem:[#allocation8] sm:$0x1]  ;;  %v80_v38 = vlaneseq  ;;  %vm34_vm13 = vcmask 7168   ;;  %vm233_vm14 = vcmask 1040384  }
   0xb   :  { %v219_v20 = vadd.f32 %v218_v19, %v60_v18  ;;  %454 = vperm.xlu0 %451, %v453_v16   ;;  %vm197_vm12 = vmand %vm196_vm11, %vm58_vm7  ;;  %v211_v35 = vld [vmem:[#allocation7] sm:$0x1]  ;;  %35 = vst.msk [vmem:[#allocation2] sm:$0xff] %vm34_vm13, %v487_v5  ;;  %s488_s10 = smov [#allocation10]  }
   0xc   :  { %v198_v22 = vsel %vm197_vm12, 1.0, %v487_v5  ;;  %v81_v39 = vshrl.u32 %v80_v38, 7  ;;  %36 = vst.msk [vmem:[#allocation2 + $0x8] sm:$0xff] %vm34_vm13, %v487_v5  ;;  %37 = vst.msk [vmem:[#allocation3] sm:$0xff] %vm34_vm13, %v487_v5  ;;  %s418_s11 = sshll.u32 %s488_s10, 4  ;;  %s419_s11 = int_to_ptr.vmem [resolvable:$true] %s418_s11 }
   0xd   :  { %220 = vst [vmem:[#allocation9] sm:$0x1] %v219_v20  ;;  %v216_v23 = vadd.f32 %v215_v21, %v198_v22  ;;  %38 = vst.msk [vmem:[#allocation3 + $0x8] sm:$0xff] %vm34_vm13, %v487_v5  ;;  %s462_s12 = scalar_lea.vmem %s419_s11, 128  ;;  %p467_p1 = scmp.lt.s32.totalorder %s419_s11, %s419_s11 }
   0xe   :  { %v82_v40 = vsub.s32 0, %v81_v39  ;;  %p463_p0 = scmp.ne.s32.totalorder %s419_s11, %s462_s12  ;;  %p468_p2 = scmp.lt.s32.totalorder %s462_s12, %s462_s12 }
   0xf   :  { %217 = vst [vmem:[#allocation8] sm:$0x1] %v216_v23 }
  0x10   :  { %v111_v41 = vrot.slane %v46_v13, %v82_v40  ;;  %v83_v42 = vrot.slane %v45_v17, %v82_v40  ;;  %v93_v45 = vrot.slane %v60_v18, %v82_v40  ;;  %p469_p3 = por %p468_p2, %p467_p1 }
  0x12   :  { %v459_v24 = vpop.eup %458  ;;  %p470_p4 = pnand %p469_p3, %p463_p0 }
  0x13   :  { %v200_v25 = vmul.f32 0.6931472, %v459_v24 }
  0x14   :  { %v461_v26 = vpop.eup %460 }
  0x15   :  { %v201_v27 = vmax.f32 %v200_v25, -100.0  ;;  %v204_v28 = vmul.f32 0.6931472, %v461_v26 }
  0x17   :  { %v205_v30 = vmax.f32 %v204_v28, -100.0  ;;  %v206_v31 = vmul.f32 %v201_v27, %v47_v10 }
  0x19   :  { %v208_v32 = vmul.f32 %v207_v29, %v205_v30  ;;  %v152_v29 = vld [vmem:[#allocation4] sm:$0x1]  ;;  %v164_v30 = vld [vmem:[#allocation5] sm:$0x1] }
  0x1b   :  { %v209_v33 = vadd.f32 %v208_v32, %v206_v31 }
  0x1d   :  { %v210_v34 = vsub.f32 0.0, %v209_v33  ;;  %v176_v33 = vld [vmem:[#allocation6] sm:$0x1] }
  0x1f   :  { %v212_v36 = vmul.f32 %v210_v34, %v198_v22 }
  0x21   :  { %v213_v37 = vadd.f32 %v212_v36, %v211_v35 }
  0x23   :  { %214 = vst [vmem:[#allocation7] sm:$0x1] %v213_v37 }
  0x81   :  { %v100_v43 = vpop.permute.xlu1 %99 }
  0x82   :  { %v72_v44 = vpop.permute.xlu0 %71  ;;  %v113_v46 = vsub.f32 %v100_v43, %v111_v41 }
  0x83   :  { %v85_v47 = vsub.f32 %v72_v44, %v83_v42 }
  0x84   :  { %v115_v48 = vand.u32 2147483647, %v113_v46 }
  0x85   :  { %v87_v49 = vand.u32 2147483647, %v85_v47  ;;  %v105_v50 = vpop.permute.xlu1 %104 }
  0x86   :  { %v77_v51 = vpop.permute.xlu0 %76  ;;  %v117_v52 = vmul.f32 %v115_v48, %v93_v45  ;;  %v114_v54 = vsub.f32 %v105_v50, %v111_v41  ;;  %v120_v48 = vld [vmem:[#allocation2 + $0x8] sm:$0xff] }
  0x87   :  { %v95_v53 = vmul.f32 %v93_v45, %v87_v49  ;;  %v86_v55 = vsub.f32 %v77_v51, %v83_v42  ;;  %v131_v49 = vld [vmem:[#allocation3 + $0x8] sm:$0xff] }
  0x88   :  { %v116_v56 = vand.u32 2147483647, %v114_v54  ;;  %v130_v54 = vld [vmem:[#allocation3] sm:$0xff] }
  0x89   :  { %v88_v57 = vand.u32 2147483647, %v86_v55  ;;  %121 = vadd.xlane.f32.xlu1 %v95_v53 }
  0x8a   :  { %v455_v58 = vpop.permute.xlu0 %454  ;;  %v118_v59 = vmul.f32 %v116_v56, %v93_v45 }
  0x8b   :  { %v96_v60 = vmul.f32 %v93_v45, %v88_v57  ;;  %v457_v61 = vunpack.i.h.bf16 %v455_v58  ;;  %v456_v62 = vunpack.i.l.bf16 %v455_v58  ;;  %v119_v45 = vld [vmem:[#allocation2] sm:$0xff] }
  0x8d   :  { %v150_v63 = vmul.f32 %v456_v62, %v95_v53  ;;  %v151_v0 = vmul.f32 %v457_v61, %v96_v60  ;;  %v177_v1 = vmul.f32 %v456_v62, %v117_v52  ;;  %v178_v2 = vmul.f32 %v457_v61, %v118_v59  ;;  %123 = vadd.xlane.f32.xlu0 %v96_v60 }
  0x8e   :  { %134 = vadd.xlane.f32.xlu1 %v118_v59 }
  0x8f   :  { %v153_v3 = vmul.f32 %v150_v63, %v95_v53  ;;  %v154_v4 = vmul.f32 %v151_v0, %v96_v60  ;;  %v165_v6 = vmul.f32 %v150_v63, %v117_v52  ;;  %v166_v7 = vmul.f32 %v151_v0, %v118_v59 }
  0x90   :  { %v179_v8 = vmul.f32 %v177_v1, %v117_v52  ;;  %v180_v9 = vmul.f32 %v178_v2, %v118_v59 }
  0x91   :  { %v155_v10 = vadd.f32 %v154_v4, %v153_v3  ;;  %v167_v11 = vadd.f32 %v166_v7, %v165_v6  ;;  %132 = vadd.xlane.f32.xlu0 %v117_v52 }
  0x92   :  { %v181_v13 = vadd.f32 %v180_v9, %v179_v8 }
  0x93   :  { %v156_v15 = vrot.slane %v155_v10, 4  ;;  %v168_v16 = vrot.slane %v167_v11, 4 }
  0x94   :  { %v182_v17 = vrot.slane %v181_v13, 4 }
  0x95   :  { %v157_v18 = vadd.f32 %v156_v15, %v155_v10  ;;  %v169_v19 = vadd.f32 %v168_v16, %v167_v11 }
  0x96   :  { %v183_v20 = vadd.f32 %v182_v17, %v181_v13 }
  0x97   :  { %v158_v21 = vrot.slane %v157_v18, 2  ;;  %v170_v22 = vrot.slane %v169_v19, 2 }
  0x98   :  { %v184_v23 = vrot.slane %v183_v20, 2 }
  0x99   :  { %v159_v24 = vadd.f32 %v158_v21, %v157_v18  ;;  %v171_v25 = vadd.f32 %v170_v22, %v169_v19  ;;  %v332_v21 = vld [vmem:[#allocation7] sm:$0x1] }
  0x9a   :  { %v185_v26 = vadd.f32 %v184_v23, %v183_v20 }
  0x9b   :  { %v160_v27 = vrot.slane %v159_v24, 1  ;;  %v172_v28 = vrot.slane %v171_v25, 1 }
  0x9c   :  { %v186_v31 = vrot.slane %v185_v26, 1 }
  0x9d   :  { %v161_v32 = vadd.f32 %v160_v27, %v159_v24  ;;  %v173_v5 = vadd.f32 %v172_v28, %v171_v25  ;;  %v343_v24 = vld [vmem:[#allocation8] sm:$0x1]  ;;  %v333_v25 = vsel %vm233_vm14, %v332_v21, 0.0 }
  0x9e   :  { %v187_v34 = vadd.f32 %v186_v31, %v185_v26  ;;  %v354_v26 = vld [vmem:[#allocation9] sm:$0x1]  ;;  %v344_v27 = vsel %vm233_vm14, %v343_v24, 0.0 }
  0x9f   :  { %v162_v35 = vadd.f32 %v161_v32, %v152_v29  ;;  %v174_v36 = vadd.f32 %v173_v5, %v164_v30  ;;  %v355_v30 = vsel %vm233_vm14, %v354_v26, 0.0 }
  0xa0   :  { %v188_v37 = vadd.f32 %v187_v34, %v176_v33 }
  0xa1   :  { %163 = vst [vmem:[#allocation4] sm:$0x1] %v162_v35  ;;  %175 = vst [vmem:[#allocation5] sm:$0x1] %v174_v36 }
  0xa2   :  { %189 = vst [vmem:[#allocation6] sm:$0x1] %v188_v37 }
  0xa8   :  { %v244_v39 = vld [vmem:[#allocation5] sm:$0x1]  ;;  %v232_v40 = vld [vmem:[#allocation4] sm:$0x1] }
  0xa9   :  { %v245_v41 = vsel %vm233_vm14, %v244_v39, 0.0  ;;  %v234_v42 = vsel %vm233_vm14, %v232_v40, 0.0  ;;  %v255_v43 = vld [vmem:[#allocation6] sm:$0x1] }
  0xaa   :  { %246 = vadd.xlane.f32.xlu1 %v245_v41  ;;  %235 = vadd.xlane.f32.xlu0 %v234_v42  ;;  %v256_v44 = vsel %vm233_vm14, %v255_v43, 0.0 }
  0xae   :  { %257 = vadd.xlane.f32.xlu0 %v256_v44 }
 0x116   :  { %v122_v46 = vpop.xlane.xlu1 %121 }
 0x117   :  { %v125_v47 = vadd.f32 %v122_v46, %v119_v45 }
 0x119   :  { %128 = vst.msk [vmem:[#allocation2] sm:$0xff] %vm34_vm13, %v125_v47 }
 0x11a   :  { %v124_v50 = vpop.xlane.xlu0 %123 }
 0x11b   :  { %v126_v51 = vadd.f32 %v124_v50, %v120_v48  ;;  %v135_v52 = vpop.xlane.xlu1 %134 }
 0x11c   :  { %v137_v53 = vadd.f32 %v135_v52, %v131_v49 }
 0x11d   :  { %129 = vst.msk [vmem:[#allocation2 + $0x8] sm:$0xff] %vm34_vm13, %v126_v51 }
 0x11e   :  { %139 = vst.msk [vmem:[#allocation3 + $0x8] sm:$0xff] %vm34_vm13, %v137_v53  ;;  %v133_v55 = vpop.xlane.xlu0 %132 }
 0x11f   :  { %v136_v56 = vadd.f32 %v133_v55, %v130_v54 }
 0x120   :  { %v224_v57 = vld [vmem:[#allocation2] sm:$0xff] }
 0x121   :  { %138 = vst.msk [vmem:[#allocation3] sm:$0xff] %vm34_vm13, %v136_v56  ;;  %v228_v58 = vmul.f32 %v224_v57, %v571_v12 }
 0x123   :  { %v266_v60 = vmul.f32 %v228_v58, %v224_v57  ;;  %v308_v19 = vsel %vm34_vm13, %v228_v58, 0.0 }
 0x124   :  { %v225_v59 = vld [vmem:[#allocation2 + $0x8] sm:$0xff] }
 0x125   :  { %v229_v61 = vmul.f32 %v225_v59, %v577_v14  ;;  %v227_v62 = vld [vmem:[#allocation3 + $0x8] sm:$0xff]  ;;  %v268_v2 = vsel %vm34_vm13, %v266_v60, 0.0 }
 0x126   :  { %v231_v63 = vmul.f32 %v227_v62, %v577_v14 }
 0x127   :  { %v267_v0 = vmul.f32 %v229_v61, %v225_v59  ;;  %v281_v1 = vmul.f32 %v229_v61, %v227_v62  ;;  %v309_v17 = vsel %vm34_vm13, %v229_v61, 0.0 }
 0x128   :  { %v226_v3 = vld [vmem:[#allocation3] sm:$0xff]  ;;  %v295_v8 = vmul.f32 %v231_v63, %v227_v62  ;;  %v310_v20 = vadd.f32 %v309_v17, %v308_v19  ;;  %v321_v22 = vsel %vm34_vm13, %v231_v63, 0.0 }
 0x129   :  { %v269_v4 = vsel %vm34_vm13, %v267_v0, 0.0  ;;  %v280_v6 = vmul.f32 %v228_v58, %v226_v3  ;;  %v230_v7 = vmul.f32 %v226_v3, %v571_v12  ;;  %v283_v11 = vsel %vm34_vm13, %v281_v1, 0.0 }
 0x12a   :  { %v270_v9 = vadd.f32 %v269_v4, %v268_v2  ;;  %v297_v16 = vsel %vm34_vm13, %v295_v8, 0.0 }
 0x12b   :  { %v282_v10 = vsel %vm34_vm13, %v280_v6, 0.0  ;;  %v294_v13 = vmul.f32 %v230_v7, %v226_v3  ;;  %v320_v12 = vsel %vm34_vm13, %v230_v7, 0.0 }
 0x12c   :  { %271 = vadd.xlane.f32.xlu1 %v270_v9  ;;  %v284_v15 = vadd.f32 %v283_v11, %v282_v10  ;;  %v322_v23 = vadd.f32 %v321_v22, %v320_v12 }
 0x12d   :  { %v296_v14 = vsel %vm34_vm13, %v294_v13, 0.0 }
 0x12e   :  { %285 = vadd.xlane.f32.xlu0 %v284_v15  ;;  %v298_v18 = vadd.f32 %v297_v16, %v296_v14 }
 0x130   :  { %299 = vadd.xlane.f32.xlu1 %v298_v18 }
 0x132   :  { %311 = vadd.xlane.f32.xlu0 %v310_v20 }
 0x134   :  { %323 = vadd.xlane.f32.xlu1 %v322_v23 }
 0x136   :  { %334 = vadd.xlane.f32.xlu0 %v333_v25 }
 0x137   :  { %v247_v28 = vpop.xlane.xlu1 %246  ;;  %v236_v29 = vpop.xlane.xlu0 %235 }
 0x138   :  { %v248_v31 = vrot.slane %v247_v28, 4  ;;  %v237_v32 = vrot.slane %v236_v29, 4  ;;  %345 = vadd.xlane.f32.xlu1 %v344_v27 }
 0x13a   :  { %v249_v5 = vadd.f32 %v248_v31, %v247_v28  ;;  %v238_v33 = vadd.f32 %v237_v32, %v236_v29  ;;  %356 = vadd.xlane.f32.xlu0 %v355_v30 }
 0x13b   :  { %v258_v34 = vpop.xlane.xlu0 %257 }
 0x13c   :  { %v250_v35 = vrot.slane %v249_v5, 2  ;;  %v239_v36 = vrot.slane %v238_v33, 2  ;;  %v259_v37 = vrot.slane %v258_v34, 4 }
 0x13e   :  { %v260_v39 = vadd.f32 %v259_v37, %v258_v34  ;;  %v240_v40 = vadd.f32 %v239_v36, %v238_v33  ;;  %v251_v41 = vadd.f32 %v250_v35, %v249_v5 }
 0x140   :  { %v261_v42 = vrot.slane %v260_v39, 2  ;;  %v241_v43 = vrot.slane %v240_v40, 1  ;;  %v252_v44 = vrot.slane %v251_v41, 1 }
 0x142   :  { %v242_v45 = vadd.f32 %v241_v43, %v240_v40  ;;  %v253_v46 = vadd.f32 %v252_v44, %v251_v41  ;;  %v262_v47 = vadd.f32 %v261_v42, %v260_v39  ;;  %v366_v43 = vand.u32 127, %v80_v38 }
 0x144   :  { %426 = vpush %v242_v45  ;;  %v263_v48 = vrot.slane %v262_v47, 1  ;;  %vm367_vm15 = vcmp.eq.s32.totalorder %v366_v43, 0  ;;  %vm371_vm0 = vcmp.eq.s32.totalorder %v366_v43, 1  ;;  %vm375_vm1 = vcmp.eq.s32.totalorder %v366_v43, 2 }
 0x145   :  { %428 = vpush %v253_v46  ;;  %vm379_vm2 = vcmp.eq.s32.totalorder %v366_v43, 3  ;;  %vm383_vm3 = vcmp.eq.s32.totalorder %v366_v43, 4  ;;  %vm387_vm4 = vcmp.eq.s32.totalorder %v366_v43, 5  ;;  %vm391_vm5 = vcmp.eq.s32.totalorder %v366_v43, 6 }
 0x146   :  { %v264_v49 = vadd.f32 %v263_v48, %v262_v47  ;;  %vm395_vm6 = vcmp.eq.s32.totalorder %v366_v43, 7  ;;  %vm399_vm7 = vcmp.eq.s32.totalorder %v366_v43, 8  ;;  %vm403_vm8 = vcmp.eq.s32.totalorder %v366_v43, 9 }
 0x147   :  { %vm407_vm9 = vcmp.eq.s32.totalorder %v366_v43, 10 }
 0x148   :  { %430 = vpush %v264_v49 }
 0x175   :  { %s427_s0 = spop %426 }
 0x176   :  { %s429_s2 = spop %428  ;;  %v368_v44 = vstv %s427_s0 }
 0x177   :  { %v372_v45 = vstv %s429_s2  ;;  %v369_v47 = vsel %vm367_vm15, %v368_v44, 0.0 }
 0x178   :  { %v373_v48 = vsel %vm371_vm0, %v372_v45, 0.0 }
 0x179   :  { %s431_s6 = spop %430 }
 0x17a   :  { %v376_v46 = vstv %s431_s6 }
 0x17b   :  { %v377_v49 = vsel %vm375_vm1, %v376_v46, 0.0 }
 0x1b9   :  { %v272_v50 = vpop.xlane.xlu1 %271 }
 0x1ba   :  { %v273_v51 = vrot.slane %v272_v50, 4 }
 0x1bb   :  { %v286_v52 = vpop.xlane.xlu0 %285 }
 0x1bc   :  { %v274_v53 = vadd.f32 %v273_v51, %v272_v50  ;;  %v287_v54 = vrot.slane %v286_v52, 4  ;;  %v374_v50 = vadd.f32 %v373_v48, %v369_v47 }
 0x1bd   :  { %v300_v55 = vpop.xlane.xlu1 %299 }
 0x1be   :  { %v275_v56 = vrot.slane %v274_v53, 2  ;;  %v288_v57 = vadd.f32 %v287_v54, %v286_v52  ;;  %v301_v58 = vrot.slane %v300_v55, 4  ;;  %v378_v51 = vadd.f32 %v377_v49, %v374_v50 }
 0x1bf   :  { %v312_v59 = vpop.xlane.xlu0 %311 }
 0x1c0   :  { %v289_v60 = vrot.slane %v288_v57, 2  ;;  %v302_v61 = vadd.f32 %v301_v58, %v300_v55  ;;  %v313_v62 = vrot.slane %v312_v59, 4  ;;  %v276_v63 = vadd.f32 %v275_v56, %v274_v53 }
 0x1c1   :  { %v324_v0 = vpop.xlane.xlu1 %323 }
 0x1c2   :  { %v303_v1 = vrot.slane %v302_v61, 2  ;;  %v314_v2 = vadd.f32 %v313_v62, %v312_v59  ;;  %v325_v3 = vrot.slane %v324_v0, 4  ;;  %v277_v4 = vrot.slane %v276_v63, 1 }
 0x1c3   :  { %v335_v6 = vpop.xlane.xlu0 %334  ;;  %v290_v7 = vadd.f32 %v289_v60, %v288_v57 }
 0x1c4   :  { %v315_v8 = vrot.slane %v314_v2, 2  ;;  %v326_v9 = vadd.f32 %v325_v3, %v324_v0  ;;  %v336_v10 = vrot.slane %v335_v6, 4  ;;  %v278_v11 = vadd.f32 %v277_v4, %v276_v63 }
 0x1c5   :  { %v346_v13 = vpop.xlane.xlu1 %345  ;;  %v291_v15 = vrot.slane %v290_v7, 1  ;;  %v304_v14 = vadd.f32 %v303_v1, %v302_v61 }
 0x1c6   :  { %v327_v16 = vrot.slane %v326_v9, 2  ;;  %v337_v17 = vadd.f32 %v336_v10, %v335_v6  ;;  %v347_v18 = vrot.slane %v346_v13, 4  ;;  %432 = vpush %v278_v11  ;;  %v316_v19 = vadd.f32 %v315_v8, %v314_v2 }
 0x1c7   :  { %v357_v12 = vpop.xlane.xlu0 %356  ;;  %v292_v20 = vadd.f32 %v291_v15, %v290_v7  ;;  %v305_v21 = vrot.slane %v304_v14, 1 }
 0x1c8   :  { %v338_v22 = vrot.slane %v337_v17, 2  ;;  %v348_v23 = vadd.f32 %v347_v18, %v346_v13  ;;  %v358_v24 = vrot.slane %v357_v12, 4  ;;  %v317_v25 = vrot.slane %v316_v19, 1 }
 0x1c9   :  { %434 = vpush %v292_v20  ;;  %v306_v26 = vadd.f32 %v305_v21, %v304_v14  ;;  %v328_v27 = vadd.f32 %v327_v16, %v326_v9 }
 0x1ca   :  { %v349_v28 = vrot.slane %v348_v23, 2  ;;  %v359_v29 = vadd.f32 %v358_v24, %v357_v12  ;;  %v318_v30 = vadd.f32 %v317_v25, %v316_v19  ;;  %v339_v31 = vadd.f32 %v338_v22, %v337_v17 }
 0x1cb   :  { %436 = vpush %v306_v26  ;;  %v329_v32 = vrot.slane %v328_v27, 1 }
 0x1cc   :  { %v350_v5 = vadd.f32 %v349_v28, %v348_v23  ;;  %v360_v33 = vrot.slane %v359_v29, 2  ;;  %438 = vpush %v318_v30  ;;  %v340_v34 = vrot.slane %v339_v31, 1 }
 0x1cd   :  { %v330_v35 = vadd.f32 %v329_v32, %v328_v27 }
 0x1ce   :  { %v361_v36 = vadd.f32 %v360_v33, %v359_v29  ;;  %v341_v37 = vadd.f32 %v340_v34, %v339_v31  ;;  %v351_v39 = vrot.slane %v350_v5, 1 }
 0x1cf   :  { %440 = vpush %v330_v35 }
 0x1d0   :  { %442 = vpush %v341_v37  ;;  %v352_v40 = vadd.f32 %v351_v39, %v350_v5  ;;  %v362_v41 = vrot.slane %v361_v36, 1 }
 0x1d2   :  { %444 = vpush %v352_v40  ;;  %v363_v42 = vadd.f32 %v362_v41, %v361_v36 }
 0x1d4   :  { %446 = vpush %v363_v42 }
 0x1f7   :  { %s433_s24 = spop %432 }
 0x1f8   :  { %v380_v52 = vstv %s433_s24 }
 0x1f9   :  { %v381_v53 = vsel %vm379_vm2, %v380_v52, 0.0 }
 0x1fa   :  { %v382_v54 = vadd.f32 %v381_v53, %v378_v51  ;;  %s435_s25 = spop %434 }
 0x1fb   :  { %v384_v38 = vstv %s435_s25 }
 0x1fc   :  { %v385_v55 = vsel %vm383_vm3, %v384_v38, 0.0  ;;  %s437_s26 = spop %436 }
 0x1fd   :  { %v386_v56 = vadd.f32 %v385_v55, %v382_v54  ;;  %v388_v57 = vstv %s437_s26  ;;  %s439_s27 = spop %438 }
 0x1fe   :  { %v389_v58 = vsel %vm387_vm4, %v388_v57, 0.0  ;;  %v392_v59 = vstv %s439_s27 }
 0x1ff   :  { %v390_v60 = vadd.f32 %v389_v58, %v386_v56  ;;  %v393_v61 = vsel %vm391_vm5, %v392_v59, 0.0 }
 0x200   :  { %s441_s28 = spop %440 }
 0x201   :  { %v394_v62 = vadd.f32 %v393_v61, %v390_v60  ;;  %v396_v63 = vstv %s441_s28  ;;  %s443_s29 = spop %442 }
 0x202   :  { %v397_v0 = vsel %vm395_vm6, %v396_v63, 0.0  ;;  %v400_v1 = vstv %s443_s29 }
 0x203   :  { %v398_v2 = vadd.f32 %v397_v0, %v394_v62  ;;  %v401_v3 = vsel %vm399_vm7, %v400_v1, 0.0  ;;  %s445_s30 = spop %444 }
 0x204   :  { %v404_v4 = vstv %s445_s30 }
 0x205   :  { %v402_v6 = vadd.f32 %v401_v3, %v398_v2  ;;  %v405_v7 = vsel %vm403_vm8, %v404_v4, 0.0  ;;  %s447_s9 = spop %446 }
 0x206   :  { %v408_v8 = vstv %s447_s9 }
 0x207   :  { %v406_v9 = vadd.f32 %v405_v7, %v402_v6  ;;  %v409_v10 = vsel %vm407_vm9, %v408_v8, 0.0 }
 0x209   :  { %v410_v11 = vadd.f32 %v409_v10, %v406_v9 }
 0x20b   :  { %411 = vst [vmem:[#allocation10] sm:$0xff] %v410_v11 }
 0x20c   :  { %473 = shalt.err (!%p470_p4)
}
 0x20d   :  { %s474_s5 = scalar_lea.hbm %s642_s8, 128 }
 0x20e   :  { %p475_p5 = scmp.ne.s32.totalorder %s642_s8, %s474_s5  ;;  %p478_p6 = scmp.lt.u32.totalorder %s474_s5, %s642_s8 }
 0x210   :  { %p480_p7 = pnand %p478_p6, %p475_p5 }
 0x212   :  { %483 = shalt.err (!%p480_p7)
}
 0x213   :  { %421 = dma.vmem_to_hbm [thread:$0]  %s419_s11, 128, %s642_s8, [#allocation11]  }
 0x214   :  { %484 = dma.done.wait [#allocation11], 128  }
 0x215   :  { %485 = vsyncadd [#allocation11], 4294967168 }
 0x216   :  { %425 = vsyncpa [#allocation11], 1 }

</bundles_post_ra>
